<compile_context>
chip_gen: v7x
topology: tpu7x:2x2x1
jax: 0.10.0
libtpu: 0.0.40
codegen_flags: <defaults>
</compile_context>

<pallas_src>
import functools
import numpy as np

import jax
import jax.numpy as jnp
from jax import lax
from jax.experimental import pallas as pl
from jax.experimental.pallas import tpu as pltpu

# -------------------- small synthetic config (mirrors module structure) --------------------
CROP_UNIT = 28          # analog of the 336px HD crop unit
PATCH = 7               # analog of patch_size=14
V_HID = 32              # CLIP vision hidden size (image_dim_out)
V_HEADS = 4
V_INT = 64              # CLIP MLP intermediate
V_LAYERS = 3            # CLIP num_hidden_layers
LAYER_IDX = -2          # vision_feature_layer
GRID = CROP_UNIT // PATCH          # 4 patches per side
NUM_POS = GRID * GRID + 1          # 17 (CLS + patches)
IMAGE_DIM_OUT = V_HID

HID = 64                # language hidden size
N_HEADS = 4
HEAD_DIM = HID // N_HEADS
INT = 128               # Llama MLP intermediate
LLM_LAYERS = 2
VOCAB_SIZE = 128
IMAGE_TOKEN_ID = 120
RMS_EPS = 1e-5
LN_EPS = 1e-5
ROPE_BASE = 10000.0


# ------------------------------------ helpers ------------------------------------
def _ceil8(n):
    return ((n + 7) // 8) * 8


def _row_tile(M, cap=512):
    """Pick a row-tile size for an M that is already a sublane multiple."""
    assert M % 8 == 0, M
    if M <= cap:
        return M
    for t in (512, 256, 128, 64, 32, 16, 8):
        if t <= cap and M % t == 0:
            return t
    return 8


def _pad_rows(x, Mp):
    if x.shape[0] == Mp:
        return x
    return jnp.pad(x, ((0, Mp - x.shape[0]), (0, 0)))


# ------------------------- Pallas kernel: fused (norm) -> matmul -> (act) -------------------------
def pallas_fused_linear(a, w, bias=None, *, prologue=None, residual=None,
                        norm_w=None, norm_b=None, epilogue=None, eps=1e-5,
                        out_dtype=jnp.float32):
    """Fused [pre-norm (+residual add)] -> x @ w (+ bias) -> [activation].

    a: (M, K), M must be a multiple of 8 (row padding is done once at model entry).
    w: (K, N) pre-cast to bf16 at init (f32 MXU accumulation).
    prologue: None | 'rmsnorm' | 'rmsnorm_add' | 'layernorm' | 'layernorm_add'
    epilogue: None | 'quick_gelu' | 'silu_gate_mul' (output N//2)
    '*_add' prologues take `residual` (f32) and also return the new residual (f32).
    K and N are full-extent blocks; only M is tiled.
    # TODO(synk): K/N grid tiling (MXU-native multiples) for production HID/INT sizes.
    """
    M, K = a.shape
    K2, N = w.shape
    assert K == K2 and M % 8 == 0
    if w.dtype != jnp.bfloat16:
        w = w.astype(jnp.bfloat16)
    has_res = prologue in ("rmsnorm_add", "layernorm_add")
    has_norm = prologue is not None
    has_ln_bias = prologue in ("layernorm", "layernorm_add")
    has_bias = bias is not None
    N_out = N // 2 if epilogue == "silu_gate_mul" else N

    tm = _row_tile(M, cap=256)

    inputs = [a]
    in_specs = [pl.BlockSpec((tm, K), lambda i: (i, 0))]
    if has_res:
        inputs.append(residual)
        in_specs.append(pl.BlockSpec((tm, K), lambda i: (i, 0)))
    if has_norm:
        inputs.append(norm_w.astype(jnp.float32).reshape(1, K))
        in_specs.append(pl.BlockSpec((1, K), lambda i: (0, 0)))
    if has_ln_bias:
        inputs.append(norm_b.astype(jnp.float32).reshape(1, K))
        in_specs.append(pl.BlockSpec((1, K), lambda i: (0, 0)))
    inputs.append(w)
    in_specs.append(pl.BlockSpec((K, N), lambda i: (0, 0)))
    if has_bias:
        inputs.append(bias.astype(jnp.float32).reshape(1, N))
        in_specs.append(pl.BlockSpec((1, N), lambda i: (0, 0)))

    def kernel(*refs):
        it = iter(refs)
        a_ref = next(it)
        r_ref = next(it) if has_res else None
        nw_ref = next(it) if has_norm else None
        nb_ref = next(it) if has_ln_bias else None
        w_ref = next(it)
        b_ref = next(it) if has_bias else None
        o_ref = next(it)
        res_ref = next(it) if has_res else None

        if has_norm:
            x = a_ref[...].astype(jnp.float32)
            if has_res:
                x = x + r_ref[...]
                res_ref[...] = x
            if prologue in ("rmsnorm", "rmsnorm_add"):
                var = jnp.mean(x * x, axis=-1, keepdims=True)
                x = x * lax.rsqrt(var + eps) * nw_ref[...]
            else:  # layernorm / layernorm_add
                mu = jnp.mean(x, axis=-1, keepdims=True)
                var = jnp.mean(jnp.square(x - mu), axis=-1, keepdims=True)
                x = (x - mu) * lax.rsqrt(var + eps) * nw_ref[...] + nb_ref[...]
            xm = x.astype(jnp.bfloat16)
        else:
            # plain matmul path: no f32 round trip (a is usually already bf16)
            xm = a_ref[...].astype(jnp.bfloat16)
        out = jnp.dot(xm, w_ref[...], preferred_element_type=jnp.float32)
        if has_bias:
            out = out + b_ref[...]
        if epilogue == "quick_gelu":            # CLIP quick_gelu: x * sigmoid(1.702 x)
            out = out * lax.logistic(1.702 * out)
        elif epilogue == "silu_gate_mul":       # [gate, up] -> silu(gate) * up
            g = out[:, :N_out]
            u = out[:, N_out:]
            out = g * lax.logistic(g) * u
        o_ref[...] = out.astype(o_ref.dtype)

    if has_res:
        out_shape = (jax.ShapeDtypeStruct((M, N_out), out_dtype),
                     jax.ShapeDtypeStruct((M, K), jnp.float32))
        out_specs = (pl.BlockSpec((tm, N_out), lambda i: (i, 0)),
                     pl.BlockSpec((tm, K), lambda i: (i, 0)))
    else:
        out_shape = jax.ShapeDtypeStruct((M, N_out), out_dtype)
        out_specs = pl.BlockSpec((tm, N_out), lambda i: (i, 0))

    return pl.pallas_call(
        kernel,
        out_shape=out_shape,
        grid=(M // tm,),
        in_specs=in_specs,
        out_specs=out_specs,
        compiler_params=pltpu.CompilerParams(dimension_semantics=("parallel",)),
    )(*inputs)


# ------------------------- Pallas kernels: standalone normalization -------------------------
def _layernorm_kernel(x_ref, g_ref, b_ref, o_ref, *, eps):
    x = x_ref[...].astype(jnp.float32)
    mu = jnp.mean(x, axis=-1, keepdims=True)
    var = jnp.mean(jnp.square(x - mu), axis=-1, keepdims=True)
    o_ref[...] = ((x - mu) * lax.rsqrt(var + eps) * g_ref[...] + b_ref[...]).astype(o_ref.dtype)


def pallas_layernorm(x, g, b, eps=LN_EPS):
    M, D = x.shape
    assert M % 8 == 0
    tm = _row_tile(M, cap=512)    # mem-bound: large row tiles (per-step overhead ~0.35us)
    return pl.pallas_call(
        functools.partial(_layernorm_kernel, eps=eps),
        out_shape=jax.ShapeDtypeStruct((M, D), jnp.float32),
        grid=(M // tm,),
        in_specs=[pl.BlockSpec((tm, D), lambda i: (i, 0)),
                  pl.BlockSpec((1, D), lambda i: (0, 0)),
                  pl.BlockSpec((1, D), lambda i: (0, 0))],
        out_specs=pl.BlockSpec((tm, D), lambda i: (i, 0)),
        compiler_params=pltpu.CompilerParams(dimension_semantics=("parallel",)),
    )(x, g.astype(jnp.float32).reshape(1, D), b.astype(jnp.float32).reshape(1, D))


def _add_rmsnorm_kernel(x_ref, r_ref, w_ref, o_ref, *, eps):
    s = x_ref[...].astype(jnp.float32) + r_ref[...].astype(jnp.float32)
    var = jnp.mean(s * s, axis=-1, keepdims=True)
    o_ref[...] = (s * lax.rsqrt(var + eps) * w_ref[...]).astype(o_ref.dtype)


def pallas_add_rmsnorm(x, r, w, eps=RMS_EPS):
    M, D = x.shape
    assert M % 8 == 0
    tm = _row_tile(M, cap=512)
    return pl.pallas_call(
        functools.partial(_add_rmsnorm_kernel, eps=eps),
        out_shape=jax.ShapeDtypeStruct((M, D), jnp.float32),
        grid=(M // tm,),
        in_specs=[pl.BlockSpec((tm, D), lambda i: (i, 0)),
                  pl.BlockSpec((tm, D), lambda i: (i, 0)),
                  pl.BlockSpec((1, D), lambda i: (0, 0))],
        out_specs=pl.BlockSpec((tm, D), lambda i: (i, 0)),
        compiler_params=pltpu.CompilerParams(dimension_semantics=("parallel",)),
    )(x, r, w.astype(jnp.float32).reshape(1, D))


# ------------------------- Pallas kernel: multi-head attention (qkv slab in, o slab out) -------------------------
def pallas_mha(qkv, *, heads, head_dim, causal, kv_len=None, cos=None, sin=None):
    """qkv: (B, S, 3*heads*head_dim) bf16 slab with [q | k | v] concatenated on the last axis.
    kv_len (static): number of valid key rows (padded keys are masked in non-causal attention;
    causal masking already excludes trailing padded keys for real query rows).
    RoPE (cos/sin of shape (S, head_dim), f32) is applied in-kernel when given.
    Returns (B, S, heads*head_dim) bf16.
    # TODO(synk): flash-style KV grid axis + head/q-tile 'parallel' axis for production S.
    """
    B, S, threeHD = qkv.shape
    HD = heads * head_dim
    assert threeHD == 3 * HD
    if qkv.dtype != jnp.bfloat16:
        qkv = qkv.astype(jnp.bfloat16)
    use_rope = cos is not None
    kv_len = S if kv_len is None else int(kv_len)
    need_mask = causal or (kv_len < S)
    scale = float(head_dim) ** -0.5
    half = head_dim // 2

    def kernel(*refs):
        if use_rope:
            qkv_ref, cos_ref, sin_ref, o_ref = refs
            cosv = cos_ref[...]
            sinv = sin_ref[...]
        else:
            qkv_ref, o_ref = refs
            cosv = sinv = None

        # Additive mask built ONCE and reused across heads (JAX does not CSE the iotas).
        # Scores stay f32 so the -1e30 sentinel is safe.
        if need_mask:
            col = lax.broadcasted_iota(jnp.int32, (S, S), 1)
            valid = col < kv_len
            if causal:
                row = lax.broadcasted_iota(jnp.int32, (S, S), 0)
                valid = jnp.logical_and(valid, col <= row)
            neg = jnp.where(valid, 0.0, -1e30).astype(jnp.float32)
        else:
            neg = None

        def rope(x):
            # TODO(synk): pltpu.roll(x, half, axis=-1) * sign would move this onto the XLU slot.
            x1 = x[:, :half]
            x2 = x[:, half:]
            rot = jnp.concatenate([-x2, x1], axis=-1)
            return x * cosv + rot * sinv

        for h in range(heads):                 # static head loop; per-head bf16 slices off the ref
            q = qkv_ref[0, :, h * head_dim:(h + 1) * head_dim]
            k = qkv_ref[0, :, HD + h * head_dim:HD + (h + 1) * head_dim]
            v = qkv_ref[0, :, 2 * HD + h * head_dim:2 * HD + (h + 1) * head_dim]
            qf = q.astype(jnp.float32)
            kf = k.astype(jnp.float32)
            if use_rope:
                qf = rope(qf)
                kf = rope(kf)
            qf = qf * scale                    # fold 1/sqrt(d) into q: SxD work, not SxS
            s = lax.dot_general(qf.astype(jnp.bfloat16), kf.astype(jnp.bfloat16),
                                (((1,), (1,)), ((), ())),
                                preferred_element_type=jnp.float32)
            if need_mask:
                s = s + neg
            m = jnp.max(s, axis=-1, keepdims=True)
            p = jnp.exp(s - m)
            l = jnp.sum(p, axis=-1, keepdims=True)
            p = p * pl.reciprocal(l, approx=True)          # EUP slot, frees VALU
            o = jnp.dot(p.astype(jnp.bfloat16), v, preferred_element_type=jnp.float32)
            # per-head store straight into the output slab (no concat relayout / vreg pile-up)
            o_ref[0, :, h * head_dim:(h + 1) * head_dim] = o.astype(o_ref.dtype)

    inputs = [qkv]
    in_specs = [pl.BlockSpec((1, S, threeHD), lambda b: (b, 0, 0))]
    if use_rope:
        inputs += [cos.astype(jnp.float32), sin.astype(jnp.float32)]
        in_specs += [pl.BlockSpec((S, head_dim), lambda b: (0, 0)),
                     pl.BlockSpec((S, head_dim), lambda b: (0, 0))]

    return pl.pallas_call(
        kernel,
        out_shape=jax.ShapeDtypeStruct((B, S, HD), jnp.bfloat16),
        grid=(B,),
        in_specs=in_specs,
        out_specs=pl.BlockSpec((1, S, HD), lambda b: (b, 0, 0)),
        compiler_params=pltpu.CompilerParams(dimension_semantics=("parallel",)),
    )(*inputs)


# ------------------------------ parameter init ------------------------------
def init_params(key):
    kit = iter(jax.random.split(key, 256))

    def nrm(shape, scale=0.02):
        return scale * jax.random.normal(next(kit), shape, dtype=jnp.float32)

    def nrm_w(shape, scale=0.02):
        # matmul weights are pre-cast to bf16 ONCE here (no per-call casts / HBM copies)
        return nrm(shape, scale).astype(jnp.bfloat16)

    p = {}
    # CLIP vision tower (Phi3HDImageEmbedding.img_processor)
    patch_w = nrm((V_HID, 3, PATCH, PATCH))               # conv weight (no bias in CLIP patch conv)
    p["patch_w2d"] = patch_w.reshape(V_HID, -1).T.astype(jnp.bfloat16)   # (C*P*P, V_HID) bf16
    p["class_emb"] = nrm((V_HID,))
    p["pos_emb"] = nrm((NUM_POS, V_HID))
    p["pre_ln_g"] = jnp.ones((V_HID,), jnp.float32)
    p["pre_ln_b"] = jnp.zeros((V_HID,), jnp.float32)
    p["v_layers"] = []
    for _ in range(V_LAYERS):
        p["v_layers"].append(dict(
            ln1_g=jnp.ones((V_HID,), jnp.float32), ln1_b=jnp.zeros((V_HID,), jnp.float32),
            qkv_w=nrm_w((V_HID, 3 * V_HID)), qkv_b=jnp.zeros((3 * V_HID,), jnp.float32),
            o_w=nrm_w((V_HID, V_HID)), o_b=jnp.zeros((V_HID,), jnp.float32),
            ln2_g=jnp.ones((V_HID,), jnp.float32), ln2_b=jnp.zeros((V_HID,), jnp.float32),
            fc1_w=nrm_w((V_HID, V_INT)), fc1_b=jnp.zeros((V_INT,), jnp.float32),
            fc2_w=nrm_w((V_INT, V_HID)), fc2_b=jnp.zeros((V_HID,), jnp.float32),
        ))
    # HD transform separators + projection MLP
    p["glb_GN"] = nrm((1, 1, 4 * IMAGE_DIM_OUT))
    p["sub_GN"] = nrm((1, 1, 1, 4 * IMAGE_DIM_OUT))
    p["proj1_w"] = nrm_w((4 * IMAGE_DIM_OUT, HID)); p["proj1_b"] = jnp.zeros((HID,), jnp.float32)
    p["proj2_w"] = nrm_w((HID, HID)); p["proj2_b"] = jnp.zeros((HID,), jnp.float32)
    # Llama language model
    p["wte"] = nrm((VOCAB_SIZE + 1, HID))                 # +1 because reference clamps to vocab_size inclusive
    p["llm_layers"] = []
    for _ in range(LLM_LAYERS):
        p["llm_layers"].append(dict(
            in_ln=jnp.ones((HID,), jnp.float32),
            qkv_w=nrm_w((HID, 3 * HID)),
            o_w=nrm_w((HID, HID)),
            post_ln=jnp.ones((HID,), jnp.float32),
            gate_up_w=nrm_w((HID, 2 * INT)),
            down_w=nrm_w((INT, HID)),
        ))
    p["final_ln"] = jnp.ones((HID,), jnp.float32)
    return p


# ------------------------------ CLIP vision tower ------------------------------
def clip_vision_features(pixel, params):
    """pixel: (N, 3, H, W) NCHW. Returns patch features at layer LAYER_IDX (CLS dropped)."""
    N, C, H, W = pixel.shape
    g = H // PATCH
    # unfold non-overlapping patches -> (N*g*g, C*P*P) rows, (c, i, j) flatten order matches conv weight
    x = pixel.reshape(N, C, g, PATCH, g, PATCH)
    x = jnp.transpose(x, (0, 2, 4, 1, 3, 5)).reshape(N * g * g, C * PATCH * PATCH)
    patches = pallas_fused_linear(x, params["patch_w2d"]).reshape(N, g * g, V_HID)

    cls = jnp.broadcast_to(params["class_emb"].reshape(1, 1, V_HID), (N, 1, V_HID))
    h = jnp.concatenate([cls, patches], axis=1) + params["pos_emb"][None]
    T = h.shape[1]
    Tp = _ceil8(T)                       # pad the token axis ONCE; padded keys masked in attention
    if Tp != T:
        h = jnp.pad(h, ((0, 0), (0, Tp - T), (0, 0)))
    M = N * Tp
    hidden = pallas_layernorm(h.reshape(M, V_HID), params["pre_ln_g"], params["pre_ln_b"])

    num_layers_to_run = V_LAYERS + LAYER_IDX + 1  # hidden_states[layer_idx] semantics
    residual = None
    hd = V_HID // V_HEADS
    for li in range(num_layers_to_run):
        lp = params["v_layers"][li]
        # ln1 (+ previous-layer residual add) fused into the qkv matmul prologue; bf16 qkv slab out
        if residual is None:
            residual = hidden
            qkv = pallas_fused_linear(hidden, lp["qkv_w"], lp["qkv_b"],
                                      prologue="layernorm",
                                      norm_w=lp["ln1_g"], norm_b=lp["ln1_b"], eps=LN_EPS,
                                      out_dtype=jnp.bfloat16)
        else:
            qkv, residual = pallas_fused_linear(hidden, lp["qkv_w"], lp["qkv_b"],
                                                prologue="layernorm_add", residual=residual,
                                                norm_w=lp["ln1_g"], norm_b=lp["ln1_b"], eps=LN_EPS,
                                                out_dtype=jnp.bfloat16)
        attn = pallas_mha(qkv.reshape(N, Tp, 3 * V_HID), heads=V_HEADS, head_dim=hd,
                          causal=False, kv_len=T)
        o = pallas_fused_linear(attn.reshape(M, V_HID), lp["o_w"], lp["o_b"])
        # residual add + ln2 fused into fc1 prologue; quick_gelu fused into its epilogue
        fc1, residual = pallas_fused_linear(o, lp["fc1_w"], lp["fc1_b"],
                                            prologue="layernorm_add", residual=residual,
                                            norm_w=lp["ln2_g"], norm_b=lp["ln2_b"],
                                            epilogue="quick_gelu", eps=LN_EPS,
                                            out_dtype=jnp.bfloat16)
        hidden = pallas_fused_linear(fc1, lp["fc2_w"], lp["fc2_b"])
    h_out = (hidden + residual).reshape(N, Tp, V_HID)   # final residual add of last layer run
    return h_out[:, 1:T, :]  # type_feature == 'patch': drop CLS (and the token-axis padding)


# ------------------------------ Phi3 HD image embedding ------------------------------
def hd_feature_transform(img_features, img_sizes, params):
    """img_features: (bs, crops, H*W, C); img_sizes: numpy (bs, 2). Mirrors the torch loop."""
    bs = img_features.shape[0]
    C = IMAGE_DIM_OUT
    H = int(round(img_features.shape[2] ** 0.5))
    Hh = H // 2
    output_imgs = []
    for b in range(bs):
        h = int(img_sizes[b, 0]) // CROP_UNIT
        w = int(img_sizes[b, 1]) // CROP_UNIT
        B_ = h * w
        glb = img_features[b, :1]
        glb = glb.reshape(1, Hh, 2, Hh, 2, C).transpose(0, 1, 3, 2, 4, 5).reshape(1, Hh, Hh, 4 * C)
        temp_glb_GN = jnp.tile(params["sub_GN"], (1, Hh, 1, 1))
        glb = jnp.concatenate([glb, temp_glb_GN], axis=2).reshape(1, -1, 4 * C)

        sub = img_features[b, 1:][:B_]
        sub = sub.reshape(B_, Hh, 2, Hh, 2, C).transpose(0, 1, 3, 2, 4, 5).reshape(B_, -1, 4 * C)
        sub = sub.reshape(1, h, w, Hh, Hh, 4 * C).transpose(0, 1, 3, 2, 4, 5).reshape(
            1, h * Hh, w * Hh, 4 * C)
        temp_sub_GN = jnp.tile(params["sub_GN"], (1, h * Hh, 1, 1))
        sub = jnp.concatenate([sub, temp_sub_GN], axis=2).reshape(1, -1, 4 * C)

        # hd_transform_order == 'glb_sub'
        output_imgs.append(jnp.concatenate([glb, params["glb_GN"], sub], axis=1))
    return output_imgs


def img_projection(x2d, params):
    L = x2d.shape[0]
    Lp = _ceil8(L)
    x2d = _pad_rows(x2d, Lp)     # pad once around the 2-layer projection, not per matmul
    y = pallas_fused_linear(x2d, params["proj1_w"], params["proj1_b"])
    y = jax.nn.gelu(y, approximate=False)   # exact erf GELU (nn.GELU()) kept in JAX glue
    y = pallas_fused_linear(y, params["proj2_w"], params["proj2_b"])
    return y[:L] if Lp != L else y


def vision_embed_tokens_forward(input_ids, pixel_values, image_sizes, params):
    """Phi3HDImageEmbedding.forward: merge text embeddings with projected HD image features."""
    ids2d = np.asarray(input_ids).reshape(1, -1)                   # view(-1, S)
    positions = np.argwhere(ids2d == IMAGE_TOKEN_ID)

    img_set, num_img_tokens = [], []
    if positions.shape[0] > 0:
        bs = pixel_values.shape[0]
        flat_pix = pixel_values.reshape((-1,) + pixel_values.shape[2:])   # flatten(0, 1)
        feats = clip_vision_features(flat_pix, params)                    # (bs*crops, H*W, C)
        HW = feats.shape[1]
        feats = feats.reshape(bs, -1, HW, IMAGE_DIM_OUT)
        out_imgs = hd_feature_transform(feats, np.asarray(image_sizes), params)
        for oi in out_imgs:
            L = oi.shape[1]
            img_set.append(img_projection(oi.reshape(L, 4 * IMAGE_DIM_OUT), params))
            num_img_tokens.append(L)

    ids_clamped = jnp.clip(jnp.asarray(ids2d), 0, VOCAB_SIZE)
    hidden = jnp.take(params["wte"], ids_clamped, axis=0)           # (1, S, HID)

    if positions.shape[0] > 0:
        idx = 0
        for i, cnt in enumerate(num_img_tokens):
            row, col = int(positions[idx, 0]), int(positions[idx, 1])
            hidden = hidden.at[row, col:col + cnt].set(img_set[i].astype(hidden.dtype))
            idx += cnt
    return jnp.squeeze(hidden, axis=0)                              # (S, HID)


# ------------------------------ Llama decoder ------------------------------
def _rope_cos_sin(positions, head_dim, base=ROPE_BASE):
    inv_freq = 1.0 / (base ** (jnp.arange(0, head_dim, 2, dtype=jnp.float32) / head_dim))
    t = positions.astype(jnp.float32)[:, None] * inv_freq[None, :]
    cos = jnp.concatenate([jnp.cos(t), jnp.cos(t)], axis=-1)
    sin = jnp.concatenate([jnp.sin(t), jnp.sin(t)], axis=-1)
    return cos, sin


def llama_forward(hidden, positions, params):
    S = hidden.shape[0]
    Sp = _ceil8(S)                       # pad the sequence ONCE (causal mask hides padded keys)
    if Sp != S:
        hidden = jnp.pad(hidden, ((0, Sp - S), (0, 0)))
        positions = jnp.concatenate([positions,
                                     jnp.zeros((Sp - S,), positions.dtype)])
    cos, sin = _rope_cos_sin(positions, HEAD_DIM)
    residual = None
    for lp in params["llm_layers"]:
        # input rmsnorm (+ residual add) fused into the qkv matmul prologue; bf16 qkv slab out
        if residual is None:
            residual = hidden
            qkv = pallas_fused_linear(hidden, lp["qkv_w"], prologue="rmsnorm",
                                      norm_w=lp["in_ln"], eps=RMS_EPS,
                                      out_dtype=jnp.bfloat16)
        else:
            qkv, residual = pallas_fused_linear(hidden, lp["qkv_w"], prologue="rmsnorm_add",
                                                residual=residual, norm_w=lp["in_ln"],
                                                eps=RMS_EPS, out_dtype=jnp.bfloat16)
        # attention with in-kernel RoPE, causal mask and softmax (no head transposes in JAX)
        attn = pallas_mha(qkv.reshape(1, Sp, 3 * HID), heads=N_HEADS, head_dim=HEAD_DIM,
                          causal=True, cos=cos, sin=sin)
        hidden = pallas_fused_linear(attn.reshape(Sp, HID), lp["o_w"])
        # post-attn rmsnorm + residual add fused into gate_up prologue; silu(gate)*up in epilogue
        mlp, residual = pallas_fused_linear(hidden, lp["gate_up_w"], prologue="rmsnorm_add",
                                            residual=residual, norm_w=lp["post_ln"],
                                            epilogue="silu_gate_mul", eps=RMS_EPS,
                                            out_dtype=jnp.bfloat16)
        hidden = pallas_fused_linear(mlp, lp["down_w"])
    out = pallas_add_rmsnorm(hidden, residual, params["final_ln"], eps=RMS_EPS)
    return out[:S] if Sp != S else out


# ------------------------------ Phi3VForCausalLM.forward ------------------------------
def phi3v_forward(input_ids, positions, pixel_values, image_sizes, params):
    inputs_embeds = vision_embed_tokens_forward(input_ids, pixel_values, image_sizes, params)
    hidden_states = llama_forward(inputs_embeds, positions, params)
    return hidden_states


if __name__ == "__main__":
    k_params, k_pix = jax.random.split(jax.random.PRNGKey(0))
    params = init_params(k_params)

    # image_sizes = (56, 28) -> h=2, w=1 crops; pixel_values carries the global image + 2 sub-crops.
    image_sizes = jnp.asarray([[2 * CROP_UNIT, CROP_UNIT]], dtype=jnp.int32)
    pixel_values = jax.random.normal(k_pix, (1, 3, 3, CROP_UNIT, CROP_UNIT), dtype=jnp.float32)

    # number of image tokens: (h*w + 1) * (H/2)^2 + 1 + (h + 1) * (H/2)  with H=4 -> 19
    Hh = GRID // 2
    h_crops, w_crops = 2, 1
    num_img_tok = (h_crops * w_crops + 1) * Hh * Hh + 1 + (h_crops + 1) * Hh

    S = 32
    ids = np.full((S,), 7, dtype=np.int32)
    ids[0] = 1
    ids[5:5 + num_img_tok] = IMAGE_TOKEN_ID
    input_ids = jnp.asarray(ids)
    positions = jnp.arange(S, dtype=jnp.int32)

    out = phi3v_forward(input_ids, positions, pixel_values, image_sizes, params)
    out = jax.block_until_ready(out)
    assert out.shape == (S, HID), out.shape
    assert bool(jnp.all(jnp.isfinite(out)))
    print("KERNEL_OK")
</pallas_src>

<mosaic_0001>
module attributes {stable_mosaic.version = 11 : i64} {
  func.func @kernel(%arg0: i32, %arg1: memref<48x147xf32, #tpu.memory_space<vmem>>, %arg2: memref<147x32xbf16, #tpu.memory_space<vmem>>, %arg3: memref<48x32xf32, #tpu.memory_space<vmem>>) attributes {dimension_semantics = [#tpu.dimension_semantics<parallel>], iteration_bounds = array<i64: 1>, scalar_prefetch = 0 : i64, scratch_operands = 0 : i64, tpu.core_type = #tpu.core_type<tc>, window_params = [{transform_indices = @transform_0, window_bounds = array<i64: 48, 147>}, {pipeline_mode = #tpu.pipeline_mode<synchronous>, transform_indices = @transform_1, window_bounds = array<i64: 147, 32>}, {transform_indices = @transform_2, window_bounds = array<i64: 48, 32>}]} {
    %c0 = arith.constant 0 : index
    %c0_0 = arith.constant 0 : index
    %0 = vector.load %arg1[%c0, %c0_0] : memref<48x147xf32, #tpu.memory_space<vmem>>, vector<48x147xf32>
    %1 = arith.truncf %0 : vector<48x147xf32> to vector<48x147xbf16>
    %c0_1 = arith.constant 0 : index
    %c0_2 = arith.constant 0 : index
    %2 = vector.load %arg2[%c0_1, %c0_2] : memref<147x32xbf16, #tpu.memory_space<vmem>>, vector<147x32xbf16>
    %cst = arith.constant dense<0.000000e+00> : vector<48x32xf32>
    %3 = tpu.matmul %1, %2, %cst {dimension_numbers = #tpu.dot_dimension_numbers<[1], [0], [0], [1], [0, 0, 1, 1], [], []>} : vector<48x147xbf16>, vector<147x32xbf16>, vector<48x32xf32> -> vector<48x32xf32>
    %c0_3 = arith.constant 0 : index
    %c0_4 = arith.constant 0 : index
    %4 = vector.load %arg3[%c0_3, %c0_4] : memref<48x32xf32, #tpu.memory_space<vmem>>, vector<48x32xf32>
    tpu.vector_store %arg3[%c0_3, %c0_4], %3 {strides = array<i32>} : memref<48x32xf32, #tpu.memory_space<vmem>>, vector<48x32xf32>,
    return
  }
  func.func @transform_0(%arg0: i32) -> (i32, i32) {
    %c0_i32 = arith.constant 0 : i32
    %c0_i32_0 = arith.constant 0 : i32
    return %arg0, %c0_i32 : i32, i32
  }
  func.func @transform_1(%arg0: i32) -> (i32, i32) {
    %c0_i32 = arith.constant 0 : i32
    %c0_i32_0 = arith.constant 0 : i32
    %c0_i32_1 = arith.constant 0 : i32
    return %c0_i32, %c0_i32_0 : i32, i32
  }
  func.func @transform_2(%arg0: i32) -> (i32, i32) {
    %c0_i32 = arith.constant 0 : i32
    %c0_i32_0 = arith.constant 0 : i32
    return %arg0, %c0_i32 : i32, i32
  }
}

</mosaic_0001>

<bundles_post_ra>
// kernel: tpu_custom_call.1
= control target key start
LH: loop header
LB: loop body
LE: loop exit
PB: predicated region body
PF: predicated region fallthrough
CT: control target
= control target key end

     0   :  { %v236_v0 = vmov 0   ;;  %vm106_vm0 = vcmask 154624   ;;  %vm116_vm1 = vcmask 1040384   ;;  %vm117_vm2 = vcmask 1041408   ;;  %s366_s1 = inlined_call_operand.vmem [shape: bf16[147,32], index: 1, kind: input, shape index: {}]   ;;  %s367_s0 = inlined_call_operand.vmem [shape: f32[48,147], index: 0, kind: input, shape index: {}]   ;;  %s368_s2 = inlined_call_operand.vmem [shape: f32[48,32], index: 2, kind: output, shape index: {}]  }
   0x1   :  { %204 = vmatprep.subr.bf16.mxu1 %v236_v0  ;;  %v226_v1 = vld [vmem:[%s366_s1] sm:$0xff]   ;;  %123 = vmatprep.subr.bf16.mxu0 %v236_v0  ;;  %v227_v2 = vld [vmem:[%s366_s1 + $0x8] sm:$0xff]   ;;  %v228_v3 = vld [vmem:[%s366_s1 + $0x10] sm:$0xff]   ;;  %v237_v15 = vmov 65535   ;;  %vm180_vm3 = vcmask 261120  }
   0x2   :  { %214 = vmatpush1.bf16.msra.mxu1 %v226_v1  ;;  %124 = vmatpush1.bf16.msra.mxu0 %v226_v1  ;;  %v17_v4 = vld [vmem:[%s367_s0 + $0x28] sm:$0xff]  ;;  %v229_v5 = vld [vmem:[%s366_s1 + $0x18] sm:$0xff]   ;;  %v230_v11 = vld [vmem:[%s366_s1 + $0x20] sm:$0xff]   ;;  %v118_v16 = vsel %vm116_vm1, 4294967295, %v237_v15 }
   0x3   :  { %205 = vmatprep.subr.bf16.mxu1 %v236_v0  ;;  %125 = vmatprep.subr.bf16.mxu0 %v236_v0  ;;  %v19_v6 = vld [vmem:[%s367_s0 + $0x38] sm:$0xff]  ;;  %v13_v8 = vld [vmem:[%s367_s0 + $0x8] sm:$0xff]  ;;  %v232_v13 = vld [vmem:[%s366_s1 + $0x30] sm:$0xff]   ;;  %v119_v19 = vsel %vm117_vm2, %v118_v16, 0 }
   0x4   :  { %v27_v7 = vpack.c.bf16 %v19_v6, %v17_v4  ;;  %v15_v9 = vld [vmem:[%s367_s0 + $0x18] sm:$0xff]  ;;  %v231_v12 = vld [vmem:[%s366_s1 + $0x28] sm:$0xff]   ;;  %v234_v17 = vld [vmem:[%s366_s1 + $0x40] sm:$0xff]  }
   0x5   :  { %v25_v10 = vpack.c.bf16 %v15_v9, %v13_v8  ;;  %v233_v14 = vld [vmem:[%s366_s1 + $0x38] sm:$0xff]   ;;  %v235_v18 = vld [vmem:[%s366_s1 + $0x48] ss:$0 sps:$4 sm:$0x33]   ;;  %v16_v20 = vld [vmem:[%s367_s0 + $0x20] sm:$0xff] }
   0x6   :  { %215 = vmatpush1.bf16.msra.mxu1 %v227_v2  ;;  %126 = vmatpush1.bf16.msra.mxu0 %v227_v2  ;;  %v121_v21 = vand.u32 %v235_v18, %v119_v19  ;;  %v18_v22 = vld [vmem:[%s367_s0 + $0x30] sm:$0xff]  ;;  %v12_v23 = vld [vmem:[%s367_s0] sm:$0xff]  ;;  %v21_v25 = vld [vmem:[%s367_s0 + $0x48] sm:$0xff] }
   0x7   :  { %206 = vmatprep.subr.bf16.mxu1 %v236_v0  ;;  %127 = vmatprep.subr.bf16.mxu0 %v236_v0  ;;  %v14_v24 = vld [vmem:[%s367_s0 + $0x10] sm:$0xff]  ;;  %v23_v26 = vld [vmem:[%s367_s0 + $0x58] sm:$0xff]  ;;  %v26_v27 = vpack.c.bf16 %v18_v22, %v16_v20  ;;  %v20_v30 = vld [vmem:[%s367_s0 + $0x40] sm:$0xff] }
   0x8   :  { %202 = vmatprep.mubr.msk.bf16.mxu1 %vm106_vm0, %v27_v7  ;;  %201 = vmatprep.mubr.msk.bf16.mxu0 %vm106_vm0, %v25_v10  ;;  %v24_v28 = vpack.c.bf16 %v14_v24, %v12_v23  ;;  %v29_v29 = vpack.c.bf16 %v23_v26, %v21_v25  ;;  %v22_v31 = vld [vmem:[%s367_s0 + $0x50] sm:$0xff] }
   0x9   :  { %v28_v32 = vpack.c.bf16 %v22_v31, %v20_v30 }
   0xa   :  { %216 = vmatpush1.bf16.msra.mxu1 %v228_v3  ;;  %128 = vmatpush1.bf16.msra.mxu0 %v228_v3 }
   0xb   :  { %207 = vmatprep.subr.bf16.mxu1 %v236_v0  ;;  %129 = vmatprep.subr.bf16.mxu0 %v236_v0 }
   0xe   :  { %217 = vmatpush1.bf16.msra.mxu1 %v229_v5  ;;  %130 = vmatpush1.bf16.msra.mxu0 %v229_v5 }
   0xf   :  { %208 = vmatprep.subr.bf16.mxu1 %v236_v0  ;;  %131 = vmatprep.subr.bf16.mxu0 %v236_v0 }
  0x12   :  { %218 = vmatpush1.bf16.msra.mxu1 %v230_v11  ;;  %132 = vmatpush1.bf16.msra.mxu0 %v230_v11 }
  0x13   :  { %209 = vmatprep.subr.bf16.mxu1 %v236_v0  ;;  %133 = vmatprep.subr.bf16.mxu0 %v236_v0 }
  0x16   :  { %219 = vmatpush1.bf16.msra.mxu1 %v231_v12  ;;  %134 = vmatpush1.bf16.msra.mxu0 %v231_v12 }
  0x17   :  { %210 = vmatprep.subr.bf16.mxu1 %v236_v0  ;;  %135 = vmatprep.subr.bf16.mxu0 %v236_v0 }
  0x1a   :  { %220 = vmatpush1.bf16.msra.mxu1 %v232_v13  ;;  %136 = vmatpush1.bf16.msra.mxu0 %v232_v13 }
  0x1b   :  { %211 = vmatprep.subr.bf16.mxu1 %v236_v0  ;;  %137 = vmatprep.subr.bf16.mxu0 %v236_v0 }
  0x1e   :  { %221 = vmatpush1.bf16.msra.mxu1 %v233_v14  ;;  %138 = vmatpush1.bf16.msra.mxu0 %v233_v14 }
  0x1f   :  { %212 = vmatprep.subr.bf16.mxu1 %v236_v0  ;;  %139 = vmatprep.subr.bf16.mxu0 %v236_v0 }
  0x22   :  { %222 = vmatpush1.bf16.msra.mxu1 %v234_v17  ;;  %140 = vmatpush1.bf16.msra.mxu0 %v234_v17 }
  0x23   :  { %213 = vmatprep.subr.bf16.mxu1 %v236_v0  ;;  %141 = vmatprep.subr.bf16.mxu0 %v236_v0 }
  0x26   :  { %223 = vmatpush1.bf16.msra.mxu1 %v121_v21  ;;  %142 = vmatpush1.bf16.msra.mxu0 %v121_v21 }
  0x29   :  { %164 = vmatmul.mubr.bf16.vlgmr.msra.gmra.mrb[0].mxu1 %v26_v27  ;;  %156 = vmatmul.mubr.bf16.vlgmr.msra.gmra.mrb[0].mxu0 %v24_v28 }
  0x2a   :  { %203 = vmatprep.mubr.msk.bf16.mxu1 %vm106_vm0, %v29_v29 }
  0x31   :  { %172 = vmatmul.mubr.bf16.gmra.mrb[4].mxu1 %v28_v32 }
  0xfc   :  { %v165_v33 = vpop.f32.mrb[0].mxu1  ;;  %v157_v34 = vpop.f32.mrb[0].mxu0 }
  0xfd   :  { %183 = vst.msk [vmem:[%s368_s2 + $0x10] sm:$0xff] %vm180_vm3, %v165_v33  ;;  %v167_v35 = vpop.f32.mrb[1].mxu1  ;;  %181 = vst.msk [vmem:[%s368_s2] sm:$0xff] %vm180_vm3, %v157_v34  ;;  %v159_v36 = vpop.f32.mrb[1].mxu0 }
  0xfe   :  { %v168_v37 = vpop.f32.mrb[2].mxu1  ;;  %v160_v38 = vpop.f32.mrb[2].mxu0 }
  0xff   :  { %184 = vst.msk [vmem:[%s368_s2 + $0x18] sm:$0xff] %vm180_vm3, %v168_v37  ;;  %v170_v39 = vpop.f32.mrb[3].mxu1  ;;  %182 = vst.msk [vmem:[%s368_s2 + $0x8] sm:$0xff] %vm180_vm3, %v160_v38  ;;  %v162_v40 = vpop.f32.mrb[3].mxu0 }
 0x104   :  { %v173_v41 = vpop.f32.mrb[4].mxu1 }
 0x105   :  { %185 = vst.msk [vmem:[%s368_s2 + $0x20] sm:$0xff] %vm180_vm3, %v173_v41  ;;  %v175_v42 = vpop.f32.mrb[5].mxu1 }
 0x106   :  { %v176_v43 = vpop.f32.mrb[6].mxu1 }
 0x107   :  { %186 = vst.msk [vmem:[%s368_s2 + $0x28] sm:$0xff] %vm180_vm3, %v176_v43  ;;  %v178_v44 = vpop.f32.mrb[7].mxu1 }

</bundles_post_ra>
